<compile_context>
chip_gen: v7x
topology: tpu7x:2x2x1
jax: 0.10.0
libtpu: 0.0.40
codegen_flags: <defaults>
</compile_context>

<pallas_src>
from itertools import combinations

import jax
import jax.numpy as jnp
import numpy as np
from jax import lax
from jax.experimental import pallas as pl
from jax.experimental.pallas import tpu as pltpu

_SCALE = 5.0                         # hard-coded `s = 5` in the PyTorch forward
_SQRT_SCALE = float(np.sqrt(_SCALE))  # folded into each operand's norm factor


def _arcface_pair_kernel(pi_ref, pj_ref, x0_ref, x1_ref, o_ref):
    # pi_ref / pj_ref: (n_pairs,) int32 in SMEM (scalar prefetch; only used by
    # the index maps). x0_ref / x1_ref: (W, h) row slabs; o_ref: (W, W) block.
    del pi_ref, pj_ref
    x0 = x0_ref[...]
    x1 = x1_ref[...]
    # Row-wise L2 normalization via rsqrt (EUP); the *5 output scale is folded
    # in as sqrt(5) per operand (removes an (W,W) VPU multiply pass).
    n0 = x0 * (lax.rsqrt(jnp.sum(x0 * x0, axis=-1, keepdims=True)) * _SQRT_SCALE)
    n1 = x1 * (lax.rsqrt(jnp.sum(x1 * x1, axis=-1, keepdims=True)) * _SQRT_SCALE)
    # bf16 MXU operands, f32 accumulation; contract last dims (no transpose copy).
    o_ref[...] = lax.dot_general(
        n0.astype(jnp.bfloat16),
        n1.astype(jnp.bfloat16),
        dimension_numbers=(((1,), (1,)), ((), ())),
        preferred_element_type=jnp.float32,
    ).astype(o_ref.dtype)


def arcface_forward(x, target):
    """x: (B, S, W, h) float32, target: (B, S, W) int32."""
    B, S, W, h = x.shape
    pairs = list(combinations(range(S), 2))
    n_pairs = len(pairs)

    pi = jnp.asarray([i for (i, _) in pairs], dtype=jnp.int32)
    pj = jnp.asarray([j for (_, j) in pairs], dtype=jnp.int32)

    flops = 2 * B * n_pairs * W * W * h + 6 * B * n_pairs * W * h
    bytes_accessed = 2 * B * n_pairs * W * h * 4 + B * n_pairs * W * W * 4

    grid_spec = pltpu.PrefetchScalarGridSpec(
        num_scalar_prefetch=2,
        grid=(B, n_pairs),
        in_specs=[
            # lhs row slab x[b, pi[p]]  (reused across consecutive pairs)
            pl.BlockSpec(
                (pl.Squeezed(), pl.Squeezed(), W, h),
                lambda b, p, pi_ref, pj_ref: (b, pi_ref[p], 0, 0),
            ),
            # rhs row slab x[b, pj[p]]
            pl.BlockSpec(
                (pl.Squeezed(), pl.Squeezed(), W, h),
                lambda b, p, pi_ref, pj_ref: (b, pj_ref[p], 0, 0),
            ),
        ],
        # Write each (W, W) pair block directly at its final position in the
        # concatenated (B*n_pairs*W, W) output (PyTorch loop order: b outer,
        # pair inner) -> no post-kernel gather/transpose over HBM.
        out_specs=pl.BlockSpec(
            (W, W),
            lambda b, p, pi_ref, pj_ref: (b * n_pairs + p, 0),
        ),
    )

    ret_x = pl.pallas_call(
        _arcface_pair_kernel,
        out_shape=jax.ShapeDtypeStruct((B * n_pairs * W, W), jnp.float32),
        grid_spec=grid_spec,
        compiler_params=pltpu.CompilerParams(
            dimension_semantics=("parallel", "parallel"),
        ),
        cost_estimate=pl.CostEstimate(
            flops=flops,
            transcendentals=2 * B * n_pairs * W,
            bytes_accessed=bytes_accessed,
        ),
    )(pi, pj, x, x)

    # Tiny integer glue (not the hot path): per-pair argmax of label equality,
    # kept as plain JAX outside the kernel.
    t0 = target[:, pi]                             # (B, n_pairs, W)
    t1 = target[:, pj]                             # (B, n_pairs, W)
    eq = t0[..., :, None] == t1[..., None, :]      # (B, n_pairs, W, W)
    ret_target = jnp.argmax(eq, axis=-1).astype(jnp.int32).reshape(-1)

    return ret_x, ret_target


def _reference(x, target):
    """Pure-JAX reference mirroring the PyTorch loop, for a sanity check."""
    B, S, W, h = x.shape
    xn = x / jnp.sqrt(jnp.sum(x * x, axis=-1, keepdims=True))
    ret_x, ret_t = [], []
    for b in range(B):
        for i, j in combinations(range(S), 2):
            x0, x1 = xn[b, i], xn[b, j]
            t0, t1 = target[b, i], target[b, j]
            ret_t.append(jnp.argmax(t0[:, None] == t1[None, :], axis=-1))
            ret_x.append(x0 @ x1.T * _SCALE)
    return jnp.concatenate(ret_x, axis=0), jnp.concatenate(ret_t, axis=0)


if __name__ == "__main__":
    key = jax.random.PRNGKey(0)
    kx, kt = jax.random.split(key)

    B, S, W, h = 2, 4, 16, 32
    x = jax.random.normal(kx, (B, S, W, h), dtype=jnp.float32)
    target = jax.random.randint(kt, (B, S, W), 0, 4, dtype=jnp.int32)

    ret_x, ret_target = arcface_forward(x, target)
    jax.block_until_ready((ret_x, ret_target))

    ref_x, ref_target = _reference(x, target)
    # bf16 MXU operands (f32 accumulation) -> loosened tolerance per review.
    np.testing.assert_allclose(
        np.asarray(ret_x), np.asarray(ref_x), rtol=2e-2, atol=5e-2
    )
    np.testing.assert_array_equal(np.asarray(ret_target), np.asarray(ref_target))

    print("KERNEL_OK")
</pallas_src>

<mosaic_0001>
module attributes {stable_mosaic.version = 11 : i64} {
  func.func @_arcface_pair_kernel(%arg0: i32, %arg1: i32, %arg2: memref<6xi32, #tpu.memory_space<smem>>, %arg3: memref<6xi32, #tpu.memory_space<smem>>, %arg4: memref<1x1x16x32xf32, #tpu.memory_space<vmem>>, %arg5: memref<1x1x16x32xf32, #tpu.memory_space<vmem>>, %arg6: memref<16x16xf32, #tpu.memory_space<vmem>>) attributes {dimension_semantics = [#tpu.dimension_semantics<parallel>, #tpu.dimension_semantics<parallel>], iteration_bounds = array<i64: 2, 6>, scalar_prefetch = 2 : i64, scratch_operands = 0 : i64, tpu.core_type = #tpu.core_type<tc>, window_params = [{transform_indices = @transform_0, window_bounds = array<i64: 1, 1, 16, 32>}, {transform_indices = @transform_1, window_bounds = array<i64: 1, 1, 16, 32>}, {transform_indices = @transform_2, window_bounds = array<i64: 16, 16>}]} {
    %c0 = arith.constant 0 : index
    %c0_0 = arith.constant 0 : index
    %c0_1 = arith.constant 0 : index
    %c0_2 = arith.constant 0 : index
    %0 = vector.load %arg4[%c0, %c0_0, %c0_1, %c0_2] : memref<1x1x16x32xf32, #tpu.memory_space<vmem>>, vector<1x1x16x32xf32>
    %1 = vector.shape_cast %0 : vector<1x1x16x32xf32> to vector<16x32xf32>
    %c0_3 = arith.constant 0 : index
    %c0_4 = arith.constant 0 : index
    %c0_5 = arith.constant 0 : index
    %c0_6 = arith.constant 0 : index
    %2 = vector.load %arg5[%c0_3, %c0_4, %c0_5, %c0_6] : memref<1x1x16x32xf32, #tpu.memory_space<vmem>>, vector<1x1x16x32xf32>
    %3 = vector.shape_cast %2 : vector<1x1x16x32xf32> to vector<16x32xf32>
    %4 = arith.mulf %1, %1 : vector<16x32xf32>
    %cst = arith.constant dense<0.000000e+00> : vector<16xf32>
    %5 = vector.multi_reduction <add>, %4, %cst [1] : vector<16x32xf32> to vector<16xf32>
    %6 = vector.shape_cast %5 : vector<16xf32> to vector<16x1xf32>
    %7 = math.rsqrt %6 : vector<16x1xf32>
    %cst_7 = arith.constant 2.23606801 : f32
    %8 = vector.broadcast %cst_7 : f32 to vector<16x1xf32>
    %9 = arith.mulf %7, %8 : vector<16x1xf32>
    %10 = vector.broadcast %9 : vector<16x1xf32> to vector<16x32xf32>
    %11 = arith.mulf %1, %10 : vector<16x32xf32>
    %12 = arith.mulf %3, %3 : vector<16x32xf32>
    %cst_8 = arith.constant dense<0.000000e+00> : vector<16xf32>
    %13 = vector.multi_reduction <add>, %12, %cst_8 [1] : vector<16x32xf32> to vector<16xf32>
    %14 = vector.shape_cast %13 : vector<16xf32> to vector<16x1xf32>
    %15 = math.rsqrt %14 : vector<16x1xf32>
    %cst_9 = arith.constant 2.23606801 : f32
    %16 = vector.broadcast %cst_9 : f32 to vector<16x1xf32>
    %17 = arith.mulf %15, %16 : vector<16x1xf32>
    %18 = vector.broadcast %17 : vector<16x1xf32> to vector<16x32xf32>
    %19 = arith.mulf %3, %18 : vector<16x32xf32>
    %20 = arith.truncf %11 : vector<16x32xf32> to vector<16x32xbf16>
    %21 = arith.truncf %19 : vector<16x32xf32> to vector<16x32xbf16>
    %cst_10 = arith.constant dense<0.000000e+00> : vector<16x16xf32>
    %22 = tpu.matmul %20, %21, %cst_10 {dimension_numbers = #tpu.dot_dimension_numbers<[1], [1], [0], [0], [0, 0, 1, 0], [], []>} : vector<16x32xbf16>, vector<16x32xbf16>, vector<16x16xf32> -> vector<16x16xf32>
    %c0_11 = arith.constant 0 : index
    %c0_12 = arith.constant 0 : index
    %23 = vector.load %arg6[%c0_11, %c0_12] : memref<16x16xf32, #tpu.memory_space<vmem>>, vector<16x16xf32>
    tpu.vector_store %arg6[%c0_11, %c0_12], %22 {strides = array<i32>} : memref<16x16xf32, #tpu.memory_space<vmem>>, vector<16x16xf32>,
    return
  }
  func.func @transform_0(%arg0: i32, %arg1: i32, %arg2: memref<6xi32, #tpu.memory_space<smem>>, %arg3: memref<6xi32, #tpu.memory_space<smem>>) -> (i32, i32, i32, i32) {
    %0 = arith.index_cast %arg1 : i32 to index
    %1 = memref.load %arg2[%0] : memref<6xi32, #tpu.memory_space<smem>>
    %c0_i32 = arith.constant 0 : i32
    %c0_i32_0 = arith.constant 0 : i32
    %c0_i32_1 = arith.constant 0 : i32
    return %arg0, %1, %c0_i32, %c0_i32_0 : i32, i32, i32, i32
  }
  func.func @transform_1(%arg0: i32, %arg1: i32, %arg2: memref<6xi32, #tpu.memory_space<smem>>, %arg3: memref<6xi32, #tpu.memory_space<smem>>) -> (i32, i32, i32, i32) {
    %0 = arith.index_cast %arg1 : i32 to index
    %1 = memref.load %arg3[%0] : memref<6xi32, #tpu.memory_space<smem>>
    %c0_i32 = arith.constant 0 : i32
    %c0_i32_0 = arith.constant 0 : i32
    %c0_i32_1 = arith.constant 0 : i32
    return %arg0, %1, %c0_i32, %c0_i32_0 : i32, i32, i32, i32
  }
  func.func @transform_2(%arg0: i32, %arg1: i32, %arg2: memref<6xi32, #tpu.memory_space<smem>>, %arg3: memref<6xi32, #tpu.memory_space<smem>>) -> (i32, i32) {
    %c6_i32 = arith.constant 6 : i32
    %0 = arith.muli %arg0, %c6_i32 : i32
    %1 = arith.addi %0, %arg1 : i32
    %c0_i32 = arith.constant 0 : i32
    %c0_i32_0 = arith.constant 0 : i32
    return %1, %c0_i32 : i32, i32
  }
}

</mosaic_0001>

<bundles_post_ra>
// kernel: tpu_custom_call.1
= control target key start
LH: loop header
LB: loop body
LE: loop exit
PB: predicated region body
PF: predicated region fallthrough
CT: control target
= control target key end

     0   :  { %s1132_s0 = inlined_call_operand.hbm [shape: s32[6], index: 0, kind: input, shape index: {}]   ;;  %s1133_s2 = inlined_call_operand.hbm [shape: f32[2,4,16,32], index: 2, kind: input, shape index: {}]   ;;  %s1134_s3 = inlined_call_operand.hbm [shape: f32[2,4,16,32], index: 3, kind: input, shape index: {}]   ;;  %s1135_s4 = inlined_call_operand.vmem [shape: f32[192,16], index: 4, kind: output, shape index: {}]   ;;  %s1136_s1 = inlined_call_operand.vmem [shape: s32[6], index: 1, kind: input, shape index: {}]  }
   0x1   :  { %1144 = sst [smem:[#allocation19_spill]] %s1133_s2  ;;  %s603_s17 = scalar_lea.hbm %s1132_s0, 16 }
   0x2   :  { %p604_p0 = scmp.ne.s32.totalorder %s1132_s0, %s603_s17  ;;  %p607_p1 = scmp.lt.u32.totalorder %s603_s17, %s1132_s0 }
   0x4   :  { %p609_p2 = pnand %p607_p1, %p604_p0 }
   0x6   :  { %612 = shalt.err (!%p609_p2)  }
   0x7   :  { %s783_s22 = smov [#allocation3]   ;;  %s11_s27 = sshll.u32 %s1136_s1, 4  ;;  %s12_s27 = int_to_ptr.vmem [resolvable:$true] %s11_s27 }
   0x8   :  { %10 = dma.hbm_to_smem %s1132_s0, 16, %s783_s22, [#allocation2] }
   0x9   :  { %s613_s28 = scalar_lea.vmem %s12_s27, 16  ;;  %p618_p4 = scmp.lt.s32.totalorder %s12_s27, %s12_s27 }
   0xa   :  { %p614_p3 = scmp.ne.s32.totalorder %s12_s27, %s613_s28  ;;  %p619_p5 = scmp.lt.s32.totalorder %s613_s28, %s613_s28 }
   0xc   :  { %p620_p6 = por %p619_p5, %p618_p4 }
   0xe   :  { %p621_p7 = pnand %p620_p6, %p614_p3 }
  0x10   :  { %624 = shalt.err (!%p621_p7)  }
  0x11   :  { %s784_s29 = smov [#allocation4]  }
  0x12   :  { %14 = dma.vmem_to_smem %s12_s27, 16, %s784_s29, [#allocation2] }
  0x13   :  { %729 = dma.done.wait [#allocation2], 32 }
  0x14   :  { %730 = vsyncadd [#allocation2], 4294967264 }
  0x15   :  { %16 = sfence }
  0x16   :  { %17 = vsyncpa [#allocation6], 0 }
  0x17   :  { %19 = vsyncpa [#allocation6 + $0x1], 0 }
  0x18   :  { %20 = vsyncpa [#allocation8], 0 }
  0x19   :  { %22 = vsyncpa [#allocation8 + $0x1], 0  ;;  %s831_s0 = smov 0   ;;  %s833_s1 = smov 0  }
  0x1a   :  { %s835_s30 = smov 0   ;;  %s837_s5 = smov 0  }
  0x1b   :  { %s839_s6 = smov 0   ;;  %s841_s7 = smov 0  }
  0x1c   :  { %s843_s8 = smov 0   ;;  %s845_s9 = smov 0  }
  0x1d   :  { %s847_s10 = smov 0   ;;  %s849_s11 = smov 0  }
  0x1e   :  { %s851_s12 = smov 0  }
  0x1f LB: > { %s453_s13 = sadd.s32 4294967295, %s781_s12   ;;  %s37_s14 = sadd.s32 1, %s773_s10  ;;  %s781_s12 = sphi %s851_s12, %s28_s12   ;;  %s777_s11 = sphi %s849_s11, %s1179_s11   ;;  %s773_s10 = sphi %s847_s10, %s1178_s10   ;;  %s769_s9 = sphi %s845_s9, %s1177_s9   ;;  %s765_s8 = sphi %s843_s8, %s1176_s8   ;;  %s761_s7 = sphi %s841_s7, %s1175_s7   ;;  %s757_s6 = sphi %s839_s6, %s1174_s6   ;;  %s753_s5 = sphi %s837_s5, %s1173_s5   ;;  %s749_s30 = sphi %s835_s30, %s1172_s30   ;;  %s745_s1 = sphi %s833_s1, %s1171_s1   ;;  %s741_s0 = sphi %s831_s0, %s1170_s0  }
  0x20   : > { %p38_p8 = scmp.ge.s32.totalorder %s37_s14, 6  ;;  %s40_s15 = sadd.s32 1, %s777_s11 }
  0x21   : > { %s44_s16 = sld [smem:[#allocation3 + %s773_s10]]  ;;  %s51_s17 = sadd.s32 1, %s761_s7 }
  0x22   : > { %s1181_s14 = smov (%p38_p8, %s37_s14), 0  ;;  %s1183_s15 = smov (!%p38_p8, %s40_s15), %s777_s11 }
  0x23   : > { %1145 = sst [smem:[#allocation16_spill]] %s1181_s14  ;;  %p58_p9 = scmp.ne.s32.totalorder %s761_s7, %s757_s6 }
  0x24   : > { %s45_s18 = sld [smem:[#allocation3 + %s1181_s14]]  ;;  %p42_p10 = scmp.ge.s32.totalorder %s1183_s15, 2 }
  0x25   : > { %p59_p11 = scmp.eq.s32.totalorder %s781_s12, 0  ;;  %p64_p12 = scmp.ne.s32.totalorder %s757_s6, %s753_s5 }
  0x26   : > { %p897_p13 = scmp.eq.s32.totalorder %s453_s13, 0  ;;  %s1185_s15 = smov (%p42_p10, %s1183_s15), 0 }
  0x27   : > { %1147 = sst [smem:[#allocation17_spill]] %s1185_s15  ;;  %p905_p0 = por %p59_p11, %p58_p9 }
  0x28   : > { %p911_p1 = por %p897_p13, %p64_p12  ;;  %s46_s22 = ssub.s32 %s777_s11, %s1185_s15 }
  0x29   : > { %s74_s23 = sld [smem:[#allocation4 + %s773_s10]]  ;;  %p1139_p3 = scmp.lt.s32.totalorder %s781_s12, 12 }
  0x2a   : > { %s1149_s21 = scalar_select %p911_p1, 1, 0 }
  0x2b   : > { %s47_s24 = ssub.s32 %s44_s16, %s45_s18  ;;  %s75_s25 = sld [smem:[#allocation4 + %s1181_s14]] }
  0x2c   : > { %s48_s26 = sor.u32 %s47_s24, %s46_s22  ;;  %s148_s27 = sand.u32 1, %s761_s7  }
  0x2d   : > { %p49_p2 = scmp.eq.s32.totalorder %s48_s26, 0  ;;  %s459_s28 = sshll.u32 %s777_s11, 3 }
  0x2e   : > { %s457_s5 = sshll.u32 %s148_s27, 4  ;;  %p943_p5 = pnand %p1139_p3, %p905_p0 }
  0x2f   : > { %s923_s29 = scalar_select %p49_p2, %s761_s7, %s51_s17  }
  0x30   : > { %s152_s18 = scalar_lea.vmem [#allocation5], %s457_s5  ;;  %p465_p6 = scmp.ge.s32.totalorder %s781_s12, 1 }
  0x31   : > { %1150 = sst [smem:[#allocation18_spill]] %s923_s29  ;;  %s77_s13 = ssub.s32 %s74_s23, %s75_s25 }
  0x32   : > { %s925_s16 = sor.u32 %s77_s13, %s46_s22  ;;  %s162_s24 = sshll.u32 %s152_s18, 4  ;;  %s928_s24 = int_to_ptr.vmem [resolvable:$true] %s162_s24 }
  0x33   : > { %s481_s26 = scalar_select %p905_p0, [#allocation3], [#allocation9] }
  0x34   : > { %s482_s17 = scalar_select %p905_p0, %s773_s10, 0 }
  0x35   : > { %s1187_s26 = smov (!%p1139_p3, %s481_s26), [#allocation11]  ;;  %p194_p7 = scmp.lt.s32.totalorder %s781_s12, 13 }
  0x36   : > { %s1189_s17 = smov (!%p1139_p3, %s482_s17), 0  ;;  %s81_s13 = sadd.s32 1, %s749_s30 }
  0x37   : > { %s153_s23 = sld [smem:[%s1187_s26 + %s1189_s17]]  ;;  %p949_p8 = pnand %p465_p6, %p194_p7 }
  0x38   : > { %p88_p9 = scmp.ne.s32.totalorder %s749_s30, %s745_s1  ;;  %s1153_s2 = sld [smem:[#allocation19_spill]] }
  0x39   : > { %s1152_s25 = scalar_select %p949_p8, 1, 0 }
  0x3a   : > { %p967_p12 = por %p88_p9, %p59_p11  ;;  %s971_s17 = scalar_lea.sflag [#allocation6], %s148_s27 }
  0x3b   : > { %p627_p2 = pneg %p943_p5 }
  0x3c   : > { %s1154_s26 = scalar_select %p967_p12, 1, 0 }
  0x3d   : > { %s458_s5 = sshll.u32 %s153_s23, 1 }
  0x3e   : > { %s159_s18 = sadd.s32 %s459_s28, %s458_s5  ;;  %s630_s5 = scalar_lea.hbm %s1153_s2, 2048 }
  0x3f   : > { %s460_s20 = sshll.u32 %s159_s18, 7 }
  0x40   : > { %s963_s29 = scalar_lea.hbm %s1153_s2, %s460_s20 }
  0x41   : > { %s625_s23 = scalar_lea.hbm %s963_s29, 256  ;;  %p631_p11 = scmp.lt.u32.totalorder %s963_s29, %s1153_s2 }
  0x42   : > { %p626_p0 = scmp.ne.s32.totalorder %s963_s29, %s625_s23  ;;  %p632_p9 = scmp.lt.u32.totalorder %s630_s5, %s625_s23 }
  0x43   : > { %p634_p10 = scmp.lt.u32.totalorder %s625_s23, %s963_s29 }
  0x44   : > { %p628_p6 = pnand %p627_p2, %p626_p0  ;;  %p633_p3 = por %p632_p9, %p631_p11 }
  0x46   : > { %p629_p7 = pneg %p628_p6  ;;  %p635_p4 = por %p634_p10, %p633_p3 }
  0x48   : > { %p636_p1 = pnand %p635_p4, %p629_p7 }
  0x4a   : > { %639 = shalt.err (!%p636_p1)
}
  0x4b   : > { %s640_s27 = scalar_lea.vmem %s928_s24, 256  ;;  %s785_s14 = smov [#allocation5]  }
  0x4c   : > { %p641_p0 = scmp.ne.s32.totalorder %s928_s24, %s640_s27  ;;  %s645_s15 = sshll.u32 %s785_s14, 4  ;;  %s646_s15 = int_to_ptr.vmem [resolvable:$false] %s645_s15 }
  0x4d   : > { %s647_s18 = scalar_lea.vmem %s646_s15, 512  ;;  %p648_p12 = scmp.lt.s32.totalorder %s928_s24, %s646_s15 }
  0x4e   : > { %p643_p6 = pnand %p641_p0, %p627_p2  ;;  %p649_p11 = scmp.lt.s32.totalorder %s647_s18, %s640_s27 }
  0x50   : > { %p644_p8 = pneg %p643_p6  ;;  %p650_p9 = por %p649_p11, %p648_p12 }
  0x52   : > { %p651_p3 = pnand %p650_p9, %p644_p8 }
  0x54   : > { %654 = shalt.err (!%p651_p3)
}
  0x55   : > { %s1142_s23 = smov 128   ;;  %s1143_s5 = smov 8  }
  0x56   : > { %494 = dma.hbm_to_vmem [thread:$0]  (!%p943_p5), %s963_s29, 256, %s928_s24, %s971_s17, %s1142_s23, %s1142_s23, %s1143_s5  }
  0x57   : > { %p1155_p1 = scmp.eq.s32.totalorder %s925_s16, 0  ;;  %p1156_p4 = scmp.ne.s32.totalorder %s745_s1, %s741_s0 }
  0x58   : > { %s172_s14 = sand.u32 1, %s749_s30   ;;  %p1158_p10 = scmp.ne.s32.totalorder %s1154_s26, 0 }
  0x59   : > { %s1007_s20 = scalar_select %p1155_p1, %s749_s30, %s81_s13  }
  0x5a   : > { %p1014_p8 = por %p1156_p4, %p897_p13  ;;  %s461_s15 = sshll.u32 %s172_s14, 4 }
  0x5b   : > { %p1159_p12 = scmp.lt.s32.totalorder %s781_s12, 12  ;;  %s176_s19 = scalar_lea.vmem [#allocation7], %s461_s15 }
  0x5c   : > { %s484_s29 = scalar_select %p1158_p10, [#allocation4], [#allocation10] }
  0x5d   : > { %p1023_p2 = pnand %p1159_p12, %p1158_p10  ;;  %p1161_p5 = pmov %p1159_p12 }
  0x5e   : > { %s485_s16 = scalar_select %p1158_p10, %s773_s10, 0 }
  0x5f   : > { %s1191_s29 = smov (!%p1161_p5, %s484_s29), [#allocation12]  ;;  %p1162_p13 = pmov %p1161_p5 }
  0x60   : > { %s186_s24 = sshll.u32 %s176_s19, 4  ;;  %s1045_s26 = scalar_lea.sflag [#allocation8], %s172_s14  ;;  %s1038_s24 = int_to_ptr.vmem [resolvable:$true] %s186_s24 }
  0x61   : > { %s1193_s16 = smov (!%p1162_p13, %s485_s16), 0  ;;  %p657_p0 = pneg %p1023_p2 }
  0x62   : > { %s177_s0 = sld [smem:[%s1191_s29 + %s1193_s16]]  ;;  %s660_s23 = scalar_lea.hbm %s1134_s3, 2048 }
  0x68   : > { %s462_s13 = sshll.u32 %s177_s0, 1 }
  0x69   : > { %s183_s17 = sadd.s32 %s462_s13, %s459_s28 }
  0x6a   : > { %s464_s18 = sshll.u32 %s183_s17, 7 }
  0x6b   : > { %s1043_s2 = scalar_lea.hbm %s1134_s3, %s464_s18 }
  0x6c   : > { %s655_s29 = scalar_lea.hbm %s1043_s2, 256  ;;  %p661_p9 = scmp.lt.u32.totalorder %s1043_s2, %s1134_s3 }
  0x6d   : > { %p656_p7 = scmp.ne.s32.totalorder %s1043_s2, %s655_s29  ;;  %p662_p3 = scmp.lt.u32.totalorder %s660_s23, %s655_s29 }
  0x6e   : > { %p664_p4 = scmp.lt.u32.totalorder %s655_s29, %s1043_s2 }
  0x6f   : > { %p658_p6 = pnand %p657_p0, %p656_p7  ;;  %p663_p1 = por %p662_p3, %p661_p9 }
  0x71   : > { %p659_p11 = pneg %p658_p6  ;;  %p665_p10 = por %p664_p4, %p663_p1 }
  0x73   : > { %p666_p12 = pnand %p665_p10, %p659_p11 }
  0x75   : > { %669 = shalt.err (!%p666_p12)
}
  0x76   : > { %s670_s14 = scalar_lea.vmem %s1038_s24, 256  ;;  %s788_s0 = smov [#allocation7]  }
  0x77   : > { %p671_p5 = scmp.ne.s32.totalorder %s1038_s24, %s670_s14  ;;  %s675_s19 = sshll.u32 %s788_s0, 4  ;;  %s676_s19 = int_to_ptr.vmem [resolvable:$false] %s675_s19 }
  0x78   : > { %s677_s13 = scalar_lea.vmem %s676_s19, 512  ;;  %p678_p6 = scmp.lt.s32.totalorder %s1038_s24, %s676_s19 }
  0x79   : > { %p673_p13 = pnand %p671_p5, %p657_p0  ;;  %p679_p9 = scmp.lt.s32.totalorder %s677_s13, %s670_s14 }
  0x7b   : > { %p674_p7 = pneg %p673_p13  ;;  %p680_p3 = por %p679_p9, %p678_p6 }
  0x7d   : > { %p681_p1 = pnand %p680_p3, %p674_p7 }
  0x7f   : > { %684 = shalt.err (!%p681_p1)
}
  0x80   : > { %s1163_s17 = smov 8   ;;  %s1164_s18 = smov 128  }
  0x81   : > { %499 = dma.hbm_to_vmem [thread:$0]  (!%p1023_p2), %s1043_s2, 256, %s1038_s24, %s1045_s26, %s1164_s18, %s1164_s18, %s1163_s17  }
  0x82   : > { %p1165_p0 = scmp.ne.s32.totalorder %s1152_s25, 0 }
  0x83   : > { %s200_s29 = sand.u32 (!%p1165_p0), 1, %s757_s6   ;;  %p1166_p11 = scmp.ne.s32.totalorder (!%p1165_p0), %s1149_s21, 0 }
  0x84   : > { %198 = sbr.rel (%p1165_p0) target bundleno = 534 (0x216), region = 28  ;;  %s466_s28 = sshll.u32 (!%p1165_p0), %s200_s29, 4 }
  0x85   : > { %s201_s15 = scalar_lea.sflag (!%p1165_p0), [#allocation6], %s200_s29  ;;  %s204_s23 = scalar_lea.vmem (!%p1165_p0), [#allocation5], %s466_s28 }
  0x8b   : > { %732 = dma.done.wait (%p1166_p11), %s201_s15, 256  }
  0x8c   : > { %734 = vsyncadd (%p1166_p11), %s201_s15, 4294967040  ;;  %s209_s22 = sand.u32 1, %s745_s1  }
  0x8d   : > { %s467_s5 = sshll.u32 %s209_s22, 4  ;;  %s210_s16 = scalar_lea.sflag [#allocation8], %s209_s22 }
  0x8e   : > { %s213_s2 = scalar_lea.vmem [#allocation7], %s467_s5 }
  0x8f   : > { %736 = dma.done.wait (%p1014_p8), %s210_s16, 256  }
  0x90   : > { %738 = vsyncadd (%p1014_p8), %s210_s16, 4294967040  ;;  %v256_v0 = vld [vmem:[%s213_s2] sm:$0xff]  ;;  %vm260_vm0 = vcmask 261120   ;;  %v257_v1 = vld [vmem:[%s213_s2 + $0x8] sm:$0xff]  ;;  %v789_v12 = vmov 0.0   ;;  %vm790_vm1 = vmmov 0  }
  0x91   : > { %v254_v2 = vld [vmem:[%s204_s23] sm:$0xff]  ;;  %v273_v3 = vmul.f32 %v256_v0, %v256_v0  ;;  %v274_v4 = vmul.f32 %v257_v1, %v257_v1  ;;  %v255_v6 = vld [vmem:[%s204_s23 + $0x8] sm:$0xff]  ;;  %475 = vmatprep.subr.bf16.mxu0 %v789_v12  ;;  %477 = vmatprep.mubr.msk.bf16.mxu0 %vm790_vm1, %v789_v12  ;;  %s243_s21 = smul.u32 6, %s769_s9  ;;  %vm336_vm2 = vcmask 130048  }
  0x92   : > { %v258_v5 = vmul.f32 %v254_v2, %v254_v2  ;;  %v259_v7 = vmul.f32 %v255_v6, %v255_v6 }
  0x93   : > { %v275_v8 = vsel %vm260_vm0, %v273_v3, 0.0  ;;  %v278_v10 = vsel %vm260_vm0, %v274_v4, 0.0  ;;  %s244_s25 = sadd.s32 %s765_s8, %s243_s21 }
  0x94   : > { %v261_v9 = vsel %vm260_vm0, %v258_v5, 0.0  ;;  %276 = vadd.xlane.f32.xlu0 %v275_v8  ;;  %v264_v11 = vsel %vm260_vm0, %v259_v7, 0.0  ;;  %s468_s27 = sshll.u32 %s244_s25, 1 }
  0x95   : > { %262 = vadd.xlane.f32.xlu1 %v261_v9  ;;  %p246_p8 = scmp.lt.s32.totalorder %s468_s27, 23 }
  0x97   : > { %s1195_s27 = smov (!%p246_p8, %s468_s27), 23 }
  0x98   : > { %279 = vadd.xlane.f32.xlu0 %v278_v10  ;;  %s469_s24 = sshll.u32 %s1195_s27, 3 }
  0x99   : > { %265 = vadd.xlane.f32.xlu1 %v264_v11  ;;  %s249_s0 = scalar_lea.vmem %s1135_s4, %s469_s24 }
 0x121   : > { %v277_v13 = vpop.xlane.xlu0 %276 }
 0x122   : > { %v263_v14 = vpop.xlane.xlu1 %262  ;;  %595 = vrsqrt.f32 %v277_v13 }
 0x125   : > { %v280_v15 = vpop.xlane.xlu0 %279 }
 0x126   : > { %v266_v16 = vpop.xlane.xlu1 %265  ;;  %597 = vrsqrt.f32 %v280_v15 }
 0x127   : > { %599 = vrsqrt.f32 %v263_v14 }
 0x128   : > { %601 = vrsqrt.f32 %v266_v16 }
 0x12c   : > { %v596_v17 = vpop.eup %595 }
 0x12d   : > { %v283_v18 = vmul.f32 2.236068, %v596_v17 }
 0x12f   : > { %v285_v23 = vmul.f32 %v283_v18, %v256_v0 }
 0x130   : > { %v598_v19 = vpop.eup %597 }
 0x131   : > { %v600_v20 = vpop.eup %599  ;;  %v284_v21 = vmul.f32 2.236068, %v598_v19 }
 0x132   : > { %v602_v22 = vpop.eup %601  ;;  %v269_v25 = vmul.f32 2.236068, %v600_v20 }
 0x133   : > { %v286_v24 = vmul.f32 %v284_v21, %v257_v1  ;;  %v270_v26 = vmul.f32 2.236068, %v602_v22 }
 0x134   : > { %v271_v29 = vmul.f32 %v269_v25, %v254_v2 }
 0x135   : > { %v288_v27 = vpack.c.bf16 %v286_v24, %v285_v23  ;;  %v272_v30 = vmul.f32 %v270_v26, %v255_v6 }
 0x137   : > { %v293_v28 = vsel %vm260_vm0, %v288_v27, 0  ;;  %v287_v31 = vpack.c.bf16 %v272_v30, %v271_v29 }
 0x138   : > { %476 = vmatpush3.bf16.xpose.msra.mxu0 %v293_v28 }
 0x13f   : > { %478 = vmatmul.mubr.msk.bf16.vlgmr.msra.gmra.mrb[0].mxu0 %vm260_vm0, %v287_v31 }
 0x212   : > { %v329_v32 = vpop.f32.mrb[0].mxu0 }
 0x213   : > { %337 = vst.msk [vmem:[%s249_s0] sm:$0xff] %vm336_vm2, %v329_v32  ;;  %v479_v33 = vpop.f32.mrb[1].mxu0 }
 0x214   : > { %v332_v34 = vpop.f32.mrb[2].mxu0 }
 0x215   : > { %338 = vst.msk [vmem:[%s249_s0 + $0x8] sm:$0xff] %vm336_vm2, %v332_v34  ;;  %v480_v35 = vpop.f32.mrb[3].mxu0 }
 0x216 PF: > { %s28_s12 = sadd.s32 1, %s781_s12   ;;  %s1167_s8 = sld [smem:[#allocation18_spill]] }
 0x217   : > { %p25_p2 = scmp.ge.s32.totalorder %s28_s12, 14   ;;  %s1168_s19 = sld [smem:[#allocation16_spill]] }
 0x218   : > { %s1169_s13 = sld [smem:[#allocation17_spill]]  ;;  %s1170_s0 = smov %s745_s1 }
 0x219   : > { %s1171_s1 = smov %s749_s30  ;;  %s1172_s30 = smov %s1007_s20 }
 0x21a   : > { %s1173_s5 = smov %s757_s6  ;;  %s1174_s6 = smov %s761_s7 }
 0x21b   : > { %s1177_s9 = smov %s777_s11  ;;  %27 = sbr.rel (!%p25_p2) target bundleno = 31 (0x1f), region = 81 }
 0x21c   : > { %s1175_s7 = smov %s1167_s8  ;;  %s1176_s8 = smov %s773_s10 }
 0x21d   : > { %s1178_s10 = smov %s1168_s19 }
 0x21e   : > { %s1179_s11 = smov %s1169_s13 }
 0x222   :  { %367 = vsyncpa [#allocation6], 1 }
 0x223   :  { %369 = vsyncpa [#allocation6 + $0x1], 1 }
 0x224   :  { %370 = vsyncpa [#allocation8], 1 }
 0x225   :  { %372 = vsyncpa [#allocation8 + $0x1], 1 }

</bundles_post_ra>
